<compile_context>
chip_gen: v7x
topology: tpu7x:2x2x1
jax: 0.10.0
libtpu: 0.0.40
codegen_flags: <defaults>
</compile_context>

<pallas_src>
import functools

import jax
import jax.numpy as jnp
from jax.experimental import pallas as pl
from jax.experimental.pallas import tpu as pltpu

LANE = 128      # TPU lane width (last dim of a vreg)
SUBLANE = 8     # TPU sublane width (second-to-last dim of a f32 vreg)


def _round_up(n, m):
    return (n + m - 1) // m * m


def _mapping_fused_kernel(x_ref, w_ref, b_ref, o_ref, *, slope, num_layers,
                          last_activation, in_dim):
    """All layers fused: x -> [linear (bf16 MXU, f32 acc) + leaky_relu] * num_layers."""
    x = x_ref[...]                                   # (tile_b, in_dim) f32
    for i in range(num_layers):                      # static -> fully unrolled
        if i == 0:
            # Static, sublane-aligned slice of the padded square -> free.
            w = w_ref[0, :in_dim, :]                 # (in_dim, D) bf16
        else:
            w = w_ref[i]                             # (D, D) bf16, zero-padded
        y = jnp.dot(x.astype(jnp.bfloat16), w,
                    preferred_element_type=jnp.float32)
        y = y + b_ref[i]                             # (1, D) f32 bias, zero-padded
        if last_activation or i < num_layers - 1:
            # LeakyReLU as a single VPU max (valid for 0 <= slope <= 1).
            y = jnp.maximum(y, slope * y)
        # bf16 inter-layer activations halve vld/vst between unrolled layers;
        # keep the final layer's f32 result for the output store.
        x = y.astype(jnp.bfloat16) if i < num_layers - 1 else y
    o_ref[...] = x.astype(o_ref.dtype)


def init_mapping_params(key, in_dim, out_dim, num_layers=8, out_dim_pos="last"):
    """Deterministic kaiming-normal weights (std = sqrt(2 / fan_in)), zero bias.

    Returns a list of (W, b) at logical shapes; W is stored transposed as
    (in_d, out_d) so the kernel computes x @ W + b directly on the MXU.
    """
    params = []
    in_d = in_dim
    for i in range(num_layers):
        if i < num_layers - 1:
            out_d = in_dim if out_dim_pos == "last" else out_dim
        else:
            out_d = out_dim
        key, sub = jax.random.split(key)
        std = (2.0 / in_d) ** 0.5
        w = std * jax.random.normal(sub, (in_d, out_d), dtype=jnp.float32)
        b = jnp.zeros((1, out_d), dtype=jnp.float32)
        params.append((w, b))
        in_d = out_d
    return params


def _pack_params(params):
    """Zero-pad every layer to a lane-dense (D, D) bf16 square; stack along layer axis.

    Zero padding is load-bearing: bias padding is zero and leaky_relu(0) == 0,
    so padded lanes stay exactly zero through all layers.
    """
    dims = [params[0][0].shape[0]] + [w.shape[1] for w, _ in params]
    D = _round_up(max(dims), LANE)
    w_stack = jnp.stack([
        jnp.zeros((D, D), jnp.bfloat16)
        .at[: w.shape[0], : w.shape[1]].set(w.astype(jnp.bfloat16))
        for w, _ in params
    ])                                                     # (L, D, D) bf16
    b_stack = jnp.stack([
        jnp.zeros((1, D), jnp.float32).at[:, : b.shape[1]].set(b)
        for _, b in params
    ])                                                     # (L, 1, D) f32
    return w_stack, b_stack, D


def _choose_tile_b(batch_pad):
    """Batch tile: >=2 grid steps once batch_pad >= 16 (v7x megacore), cap 2048,
    sized to minimize round-up overshoot while amortizing per-step overhead."""
    if batch_pad < 2 * SUBLANE:
        return batch_pad                       # tiny batch: single grid step
    half = _round_up((batch_pad + 1) // 2, SUBLANE)
    return min(2048, half)


def mapping_forward(x, params, *, slope=0.2, last_activation=True):
    """Mapping.forward: fused sequential MappingBlocks in a single pallas_call."""
    assert 0.0 <= slope <= 1.0, "LeakyReLU-as-max trick requires 0 <= slope <= 1"
    num_layers = len(params)
    in_dim = params[0][0].shape[0]
    out_dim = params[-1][0].shape[1]
    w_stack, b_stack, D = _pack_params(params)

    batch = x.shape[0]
    batch_pad = _round_up(batch, SUBLANE)
    tile_b = _choose_tile_b(batch_pad)
    batch_pad = _round_up(batch_pad, tile_b)
    if batch_pad != batch:
        # Only sublane (row) padding; no lane padding of x -> 4x less input DMA.
        x_in = jnp.zeros((batch_pad, in_dim), x.dtype).at[:batch].set(x)
    else:
        x_in = x

    kernel = functools.partial(
        _mapping_fused_kernel,
        slope=slope,
        num_layers=num_layers,
        last_activation=last_activation,
        in_dim=in_dim,
    )

    out_pad = pl.pallas_call(
        kernel,
        out_shape=jax.ShapeDtypeStruct((batch_pad, D), x.dtype),
        grid=(batch_pad // tile_b,),
        in_specs=[
            pl.BlockSpec((tile_b, in_dim), lambda i: (i, 0)),         # unpadded activations
            pl.BlockSpec((num_layers, D, D), lambda i: (0, 0, 0)),    # bf16 W stack (resident)
            pl.BlockSpec((num_layers, 1, D), lambda i: (0, 0, 0)),    # f32 b stack (resident)
        ],
        out_specs=pl.BlockSpec((tile_b, D), lambda i: (i, 0)),        # lane-dense (D=128)
        compiler_params=pltpu.CompilerParams(
            dimension_semantics=("parallel",)),
    )(x_in, w_stack, b_stack)

    return out_pad[:batch, :out_dim]


if __name__ == "__main__":
    # Small shapes consistent with the module: Mapping(in_dim=32, out_dim=16, num_layers=8)
    batch, in_dim, out_dim, num_layers = 8, 32, 16, 8
    slope = 0.2

    key = jax.random.PRNGKey(0)
    key_x, key_p = jax.random.split(key)
    x = jax.random.normal(key_x, (batch, in_dim), dtype=jnp.float32)
    params = init_mapping_params(key_p, in_dim, out_dim, num_layers=num_layers)

    out = mapping_forward(x, params, slope=slope, last_activation=True)
    out = jax.block_until_ready(out)

    # Pure-JAX reference of the same math (bf16 MXU operands, f32 accumulation,
    # bf16 inter-layer activations) so the check validates the kernel, not dtype drift.
    ref = x
    for i, (w, b) in enumerate(params):
        y = jnp.dot(ref.astype(jnp.bfloat16), w.astype(jnp.bfloat16),
                    preferred_element_type=jnp.float32) + b
        y = jnp.where(y >= 0, y, slope * y)
        ref = y.astype(jnp.bfloat16).astype(jnp.float32) if i < num_layers - 1 else y

    assert out.shape == (batch, out_dim)
    max_err = float(jnp.max(jnp.abs(out - ref)))
    assert jnp.allclose(out, ref, atol=1e-2, rtol=1e-2), max_err

    print("KERNEL_OK")
</pallas_src>

<mosaic_0001>
module attributes {stable_mosaic.version = 11 : i64} {
  func.func @_mapping_fused_kernel(%arg0: i32, %arg1: memref<8x32xf32, #tpu.memory_space<vmem>>, %arg2: memref<8x128x128xbf16, #tpu.memory_space<vmem>>, %arg3: memref<8x1x128xf32, #tpu.memory_space<vmem>>, %arg4: memref<8x128xf32, #tpu.memory_space<vmem>>) attributes {dimension_semantics = [#tpu.dimension_semantics<parallel>], iteration_bounds = array<i64: 1>, scalar_prefetch = 0 : i64, scratch_operands = 0 : i64, tpu.core_type = #tpu.core_type<tc>, window_params = [{transform_indices = @transform_0, window_bounds = array<i64: 8, 32>}, {pipeline_mode = #tpu.pipeline_mode<synchronous>, transform_indices = @transform_1, window_bounds = array<i64: 8, 128, 128>}, {pipeline_mode = #tpu.pipeline_mode<synchronous>, transform_indices = @transform_2, window_bounds = array<i64: 8, 1, 128>}, {transform_indices = @transform_3, window_bounds = array<i64: 8, 128>}]} {
    %c0 = arith.constant 0 : index
    %c0_0 = arith.constant 0 : index
    %0 = vector.load %arg1[%c0, %c0_0] : memref<8x32xf32, #tpu.memory_space<vmem>>, vector<8x32xf32>
    %c0_1 = arith.constant 0 : index
    %c0_2 = arith.constant 0 : index
    %c0_3 = arith.constant 0 : index
    %1 = vector.load %arg2[%c0_1, %c0_2, %c0_3] : memref<8x128x128xbf16, #tpu.memory_space<vmem>>, vector<1x32x128xbf16>
    %2 = vector.shape_cast %1 : vector<1x32x128xbf16> to vector<32x128xbf16>
    %3 = arith.truncf %0 : vector<8x32xf32> to vector<8x32xbf16>
    %cst = arith.constant dense<0.000000e+00> : vector<8x128xf32>
    %4 = tpu.matmul %3, %2, %cst {dimension_numbers = #tpu.dot_dimension_numbers<[1], [0], [0], [1], [0, 0, 1, 1], [], []>} : vector<8x32xbf16>, vector<32x128xbf16>, vector<8x128xf32> -> vector<8x128xf32>
    %c0_4 = arith.constant 0 : index
    %c0_5 = arith.constant 0 : index
    %c0_6 = arith.constant 0 : index
    %5 = vector.load %arg3[%c0_4, %c0_5, %c0_6] : memref<8x1x128xf32, #tpu.memory_space<vmem>>, vector<1x1x128xf32>
    %6 = vector.shape_cast %5 : vector<1x1x128xf32> to vector<1x128xf32>
    %7 = vector.broadcast %6 : vector<1x128xf32> to vector<8x128xf32>
    %8 = arith.addf %4, %7 : vector<8x128xf32>
    %cst_7 = arith.constant 2.000000e-01 : f32
    %9 = vector.broadcast %cst_7 : f32 to vector<8x128xf32>
    %10 = arith.mulf %9, %8 : vector<8x128xf32>
    %11 = arith.maximumf %8, %10 : vector<8x128xf32>
    %12 = arith.truncf %11 : vector<8x128xf32> to vector<8x128xbf16>
    %c1 = arith.constant 1 : index
    %c0_8 = arith.constant 0 : index
    %c0_9 = arith.constant 0 : index
    %13 = vector.load %arg2[%c1, %c0_8, %c0_9] : memref<8x128x128xbf16, #tpu.memory_space<vmem>>, vector<1x128x128xbf16>
    %14 = vector.shape_cast %13 : vector<1x128x128xbf16> to vector<128x128xbf16>
    %cst_10 = arith.constant dense<0.000000e+00> : vector<8x128xf32>
    %15 = tpu.matmul %12, %14, %cst_10 {dimension_numbers = #tpu.dot_dimension_numbers<[1], [0], [0], [1], [0, 0, 1, 1], [], []>} : vector<8x128xbf16>, vector<128x128xbf16>, vector<8x128xf32> -> vector<8x128xf32>
    %c1_11 = arith.constant 1 : index
    %c0_12 = arith.constant 0 : index
    %c0_13 = arith.constant 0 : index
    %16 = vector.load %arg3[%c1_11, %c0_12, %c0_13] : memref<8x1x128xf32, #tpu.memory_space<vmem>>, vector<1x1x128xf32>
    %17 = vector.shape_cast %16 : vector<1x1x128xf32> to vector<1x128xf32>
    %18 = vector.broadcast %17 : vector<1x128xf32> to vector<8x128xf32>
    %19 = arith.addf %15, %18 : vector<8x128xf32>
    %cst_14 = arith.constant 2.000000e-01 : f32
    %20 = vector.broadcast %cst_14 : f32 to vector<8x128xf32>
    %21 = arith.mulf %20, %19 : vector<8x128xf32>
    %22 = arith.maximumf %19, %21 : vector<8x128xf32>
    %23 = arith.truncf %22 : vector<8x128xf32> to vector<8x128xbf16>
    %c2 = arith.constant 2 : index
    %c0_15 = arith.constant 0 : index
    %c0_16 = arith.constant 0 : index
    %24 = vector.load %arg2[%c2, %c0_15, %c0_16] : memref<8x128x128xbf16, #tpu.memory_space<vmem>>, vector<1x128x128xbf16>
    %25 = vector.shape_cast %24 : vector<1x128x128xbf16> to vector<128x128xbf16>
    %cst_17 = arith.constant dense<0.000000e+00> : vector<8x128xf32>
    %26 = tpu.matmul %23, %25, %cst_17 {dimension_numbers = #tpu.dot_dimension_numbers<[1], [0], [0], [1], [0, 0, 1, 1], [], []>} : vector<8x128xbf16>, vector<128x128xbf16>, vector<8x128xf32> -> vector<8x128xf32>
    %c2_18 = arith.constant 2 : index
    %c0_19 = arith.constant 0 : index
    %c0_20 = arith.constant 0 : index
    %27 = vector.load %arg3[%c2_18, %c0_19, %c0_20] : memref<8x1x128xf32, #tpu.memory_space<vmem>>, vector<1x1x128xf32>
    %28 = vector.shape_cast %27 : vector<1x1x128xf32> to vector<1x128xf32>
    %29 = vector.broadcast %28 : vector<1x128xf32> to vector<8x128xf32>
    %30 = arith.addf %26, %29 : vector<8x128xf32>
    %cst_21 = arith.constant 2.000000e-01 : f32
    %31 = vector.broadcast %cst_21 : f32 to vector<8x128xf32>
    %32 = arith.mulf %31, %30 : vector<8x128xf32>
    %33 = arith.maximumf %30, %32 : vector<8x128xf32>
    %34 = arith.truncf %33 : vector<8x128xf32> to vector<8x128xbf16>
    %c3 = arith.constant 3 : index
    %c0_22 = arith.constant 0 : index
    %c0_23 = arith.constant 0 : index
    %35 = vector.load %arg2[%c3, %c0_22, %c0_23] : memref<8x128x128xbf16, #tpu.memory_space<vmem>>, vector<1x128x128xbf16>
    %36 = vector.shape_cast %35 : vector<1x128x128xbf16> to vector<128x128xbf16>
    %cst_24 = arith.constant dense<0.000000e+00> : vector<8x128xf32>
    %37 = tpu.matmul %34, %36, %cst_24 {dimension_numbers = #tpu.dot_dimension_numbers<[1], [0], [0], [1], [0, 0, 1, 1], [], []>} : vector<8x128xbf16>, vector<128x128xbf16>, vector<8x128xf32> -> vector<8x128xf32>
    %c3_25 = arith.constant 3 : index
    %c0_26 = arith.constant 0 : index
    %c0_27 = arith.constant 0 : index
    %38 = vector.load %arg3[%c3_25, %c0_26, %c0_27] : memref<8x1x128xf32, #tpu.memory_space<vmem>>, vector<1x1x128xf32>
    %39 = vector.shape_cast %38 : vector<1x1x128xf32> to vector<1x128xf32>
    %40 = vector.broadcast %39 : vector<1x128xf32> to vector<8x128xf32>
    %41 = arith.addf %37, %40 : vector<8x128xf32>
    %cst_28 = arith.constant 2.000000e-01 : f32
    %42 = vector.broadcast %cst_28 : f32 to vector<8x128xf32>
    %43 = arith.mulf %42, %41 : vector<8x128xf32>
    %44 = arith.maximumf %41, %43 : vector<8x128xf32>
    %45 = arith.truncf %44 : vector<8x128xf32> to vector<8x128xbf16>
    %c4 = arith.constant 4 : index
    %c0_29 = arith.constant 0 : index
    %c0_30 = arith.constant 0 : index
    %46 = vector.load %arg2[%c4, %c0_29, %c0_30] : memref<8x128x128xbf16, #tpu.memory_space<vmem>>, vector<1x128x128xbf16>
    %47 = vector.shape_cast %46 : vector<1x128x128xbf16> to vector<128x128xbf16>
    %cst_31 = arith.constant dense<0.000000e+00> : vector<8x128xf32>
    %48 = tpu.matmul %45, %47, %cst_31 {dimension_numbers = #tpu.dot_dimension_numbers<[1], [0], [0], [1], [0, 0, 1, 1], [], []>} : vector<8x128xbf16>, vector<128x128xbf16>, vector<8x128xf32> -> vector<8x128xf32>
    %c4_32 = arith.constant 4 : index
    %c0_33 = arith.constant 0 : index
    %c0_34 = arith.constant 0 : index
    %49 = vector.load %arg3[%c4_32, %c0_33, %c0_34] : memref<8x1x128xf32, #tpu.memory_space<vmem>>, vector<1x1x128xf32>
    %50 = vector.shape_cast %49 : vector<1x1x128xf32> to vector<1x128xf32>
    %51 = vector.broadcast %50 : vector<1x128xf32> to vector<8x128xf32>
    %52 = arith.addf %48, %51 : vector<8x128xf32>
    %cst_35 = arith.constant 2.000000e-01 : f32
    %53 = vector.broadcast %cst_35 : f32 to vector<8x128xf32>
    %54 = arith.mulf %53, %52 : vector<8x128xf32>
    %55 = arith.maximumf %52, %54 : vector<8x128xf32>
    %56 = arith.truncf %55 : vector<8x128xf32> to vector<8x128xbf16>
    %c5 = arith.constant 5 : index
    %c0_36 = arith.constant 0 : index
    %c0_37 = arith.constant 0 : index
    %57 = vector.load %arg2[%c5, %c0_36, %c0_37] : memref<8x128x128xbf16, #tpu.memory_space<vmem>>, vector<1x128x128xbf16>
    %58 = vector.shape_cast %57 : vector<1x128x128xbf16> to vector<128x128xbf16>
    %cst_38 = arith.constant dense<0.000000e+00> : vector<8x128xf32>
    %59 = tpu.matmul %56, %58, %cst_38 {dimension_numbers = #tpu.dot_dimension_numbers<[1], [0], [0], [1], [0, 0, 1, 1], [], []>} : vector<8x128xbf16>, vector<128x128xbf16>, vector<8x128xf32> -> vector<8x128xf32>
    %c5_39 = arith.constant 5 : index
    %c0_40 = arith.constant 0 : index
    %c0_41 = arith.constant 0 : index
    %60 = vector.load %arg3[%c5_39, %c0_40, %c0_41] : memref<8x1x128xf32, #tpu.memory_space<vmem>>, vector<1x1x128xf32>
    %61 = vector.shape_cast %60 : vector<1x1x128xf32> to vector<1x128xf32>
    %62 = vector.broadcast %61 : vector<1x128xf32> to vector<8x128xf32>
    %63 = arith.addf %59, %62 : vector<8x128xf32>
    %cst_42 = arith.constant 2.000000e-01 : f32
    %64 = vector.broadcast %cst_42 : f32 to vector<8x128xf32>
    %65 = arith.mulf %64, %63 : vector<8x128xf32>
    %66 = arith.maximumf %63, %65 : vector<8x128xf32>
    %67 = arith.truncf %66 : vector<8x128xf32> to vector<8x128xbf16>
    %c6 = arith.constant 6 : index
    %c0_43 = arith.constant 0 : index
    %c0_44 = arith.constant 0 : index
    %68 = vector.load %arg2[%c6, %c0_43, %c0_44] : memref<8x128x128xbf16, #tpu.memory_space<vmem>>, vector<1x128x128xbf16>
    %69 = vector.shape_cast %68 : vector<1x128x128xbf16> to vector<128x128xbf16>
    %cst_45 = arith.constant dense<0.000000e+00> : vector<8x128xf32>
    %70 = tpu.matmul %67, %69, %cst_45 {dimension_numbers = #tpu.dot_dimension_numbers<[1], [0], [0], [1], [0, 0, 1, 1], [], []>} : vector<8x128xbf16>, vector<128x128xbf16>, vector<8x128xf32> -> vector<8x128xf32>
    %c6_46 = arith.constant 6 : index
    %c0_47 = arith.constant 0 : index
    %c0_48 = arith.constant 0 : index
    %71 = vector.load %arg3[%c6_46, %c0_47, %c0_48] : memref<8x1x128xf32, #tpu.memory_space<vmem>>, vector<1x1x128xf32>
    %72 = vector.shape_cast %71 : vector<1x1x128xf32> to vector<1x128xf32>
    %73 = vector.broadcast %72 : vector<1x128xf32> to vector<8x128xf32>
    %74 = arith.addf %70, %73 : vector<8x128xf32>
    %cst_49 = arith.constant 2.000000e-01 : f32
    %75 = vector.broadcast %cst_49 : f32 to vector<8x128xf32>
    %76 = arith.mulf %75, %74 : vector<8x128xf32>
    %77 = arith.maximumf %74, %76 : vector<8x128xf32>
    %78 = arith.truncf %77 : vector<8x128xf32> to vector<8x128xbf16>
    %c7 = arith.constant 7 : index
    %c0_50 = arith.constant 0 : index
    %c0_51 = arith.constant 0 : index
    %79 = vector.load %arg2[%c7, %c0_50, %c0_51] : memref<8x128x128xbf16, #tpu.memory_space<vmem>>, vector<1x128x128xbf16>
    %80 = vector.shape_cast %79 : vector<1x128x128xbf16> to vector<128x128xbf16>
    %cst_52 = arith.constant dense<0.000000e+00> : vector<8x128xf32>
    %81 = tpu.matmul %78, %80, %cst_52 {dimension_numbers = #tpu.dot_dimension_numbers<[1], [0], [0], [1], [0, 0, 1, 1], [], []>} : vector<8x128xbf16>, vector<128x128xbf16>, vector<8x128xf32> -> vector<8x128xf32>
    %c7_53 = arith.constant 7 : index
    %c0_54 = arith.constant 0 : index
    %c0_55 = arith.constant 0 : index
    %82 = vector.load %arg3[%c7_53, %c0_54, %c0_55] : memref<8x1x128xf32, #tpu.memory_space<vmem>>, vector<1x1x128xf32>
    %83 = vector.shape_cast %82 : vector<1x1x128xf32> to vector<1x128xf32>
    %84 = vector.broadcast %83 : vector<1x128xf32> to vector<8x128xf32>
    %85 = arith.addf %81, %84 : vector<8x128xf32>
    %cst_56 = arith.constant 2.000000e-01 : f32
    %86 = vector.broadcast %cst_56 : f32 to vector<8x128xf32>
    %87 = arith.mulf %86, %85 : vector<8x128xf32>
    %88 = arith.maximumf %85, %87 : vector<8x128xf32>
    %c0_57 = arith.constant 0 : index
    %c0_58 = arith.constant 0 : index
    %89 = vector.load %arg4[%c0_57, %c0_58] : memref<8x128xf32, #tpu.memory_space<vmem>>, vector<8x128xf32>
    tpu.vector_store %arg4[%c0_57, %c0_58], %88 {strides = array<i32>} : memref<8x128xf32, #tpu.memory_space<vmem>>, vector<8x128xf32>,
    return
  }
  func.func @transform_0(%arg0: i32) -> (i32, i32) {
    %c0_i32 = arith.constant 0 : i32
    %c0_i32_0 = arith.constant 0 : i32
    return %arg0, %c0_i32 : i32, i32
  }
  func.func @transform_1(%arg0: i32) -> (i32, i32, i32) {
    %c0_i32 = arith.constant 0 : i32
    %c0_i32_0 = arith.constant 0 : i32
    %c0_i32_1 = arith.constant 0 : i32
    %c0_i32_2 = arith.constant 0 : i32
    return %c0_i32, %c0_i32_0, %c0_i32_1 : i32, i32, i32
  }
  func.func @transform_2(%arg0: i32) -> (i32, i32, i32) {
    %c0_i32 = arith.constant 0 : i32
    %c0_i32_0 = arith.constant 0 : i32
    %c0_i32_1 = arith.constant 0 : i32
    %c0_i32_2 = arith.constant 0 : i32
    return %c0_i32, %c0_i32_0, %c0_i32_1 : i32, i32, i32
  }
  func.func @transform_3(%arg0: i32) -> (i32, i32) {
    %c0_i32 = arith.constant 0 : i32
    %c0_i32_0 = arith.constant 0 : i32
    return %arg0, %c0_i32 : i32, i32
  }
}

</mosaic_0001>

<bundles_post_ra>
// kernel: tpu_custom_call.1
= control target key start
LH: loop header
LB: loop body
LE: loop exit
PB: predicated region body
PF: predicated region fallthrough
CT: control target
= control target key end

     0   :  { %8 = vsyncpa [#allocation3], 0  ;;  %s1550_s0 = inlined_call_operand.hbm [shape: f32[8,32], index: 0, kind: input, shape index: {}]   ;;  %s1551_s1 = inlined_call_operand.hbm [shape: bf16[8,128,128], index: 1, kind: input, shape index: {}]   ;;  %s1552_s2 = inlined_call_operand.hbm [shape: f32[8,1,128], index: 2, kind: input, shape index: {}]   ;;  %s1553_s3 = inlined_call_operand.hbm [shape: f32[8,128], index: 3, kind: output, shape index: {}]  }
   0x1   :  { %9 = vsyncpa [#allocation6], 0 }
   0x2   :  { %10 = vsyncpa [#allocation4], 0  ;;  %s1398_s12 = smov [#allocation5]   ;;  %s1304_s16 = scalar_lea.hbm %s1551_s1, 8192 }
   0x3   :  { %s26_s13 = sshll.u32 %s1398_s12, 4  ;;  %p1305_p0 = scmp.ne.s32.totalorder %s1551_s1, %s1304_s16  ;;  %s27_s13 = int_to_ptr.vmem [resolvable:$true] %s26_s13 }
   0x4   :  { %p1308_p1 = scmp.lt.u32.totalorder %s1304_s16, %s1551_s1 }
   0x6   :  { %p1310_p2 = pnand %p1308_p1, %p1305_p0 }
   0x8   :  { %1313 = shalt.err (!%p1310_p2)
}
   0x9   :  { %s1314_s21 = scalar_lea.vmem %s27_s13, 8192  ;;  %p1319_p4 = scmp.lt.s32.totalorder %s27_s13, %s27_s13 }
   0xa   :  { %p1315_p3 = scmp.ne.s32.totalorder %s27_s13, %s1314_s21  ;;  %p1320_p5 = scmp.lt.s32.totalorder %s1314_s21, %s1314_s21 }
   0xc   :  { %p1321_p6 = por %p1320_p5, %p1319_p4 }
   0xe   :  { %p1322_p7 = pnand %p1321_p6, %p1315_p3 }
  0x10   :  { %1325 = shalt.err (!%p1322_p7)
}
  0x11   :  { %s1399_s22 = smov 64   ;;  %s1400_s23 = smov 4  }
  0x12   :  { %32 = dma.hbm_to_vmem [thread:$0]  %s1551_s1, 8192, %s27_s13, [#allocation6], %s1399_s22, %s1399_s22, %s1400_s23  }
  0x13   :  { %s1401_s26 = smov [#allocation2]   ;;  %s1402_s28 = smov [#allocation7]  }
  0x14   :  { %s17_s27 = sshll.u32 %s1401_s26, 4  ;;  %s38_s29 = sshll.u32 %s1402_s28, 4  ;;  %s18_s27 = int_to_ptr.vmem [resolvable:$true] %s17_s27  ;;  %s39_s29 = int_to_ptr.vmem [resolvable:$true] %s38_s29 }
  0x15   :  { %s1326_s5 = scalar_lea.hbm %s1550_s0, 128 }
  0x16   :  { %p1327_p8 = scmp.ne.s32.totalorder %s1550_s0, %s1326_s5  ;;  %p1330_p9 = scmp.lt.u32.totalorder %s1326_s5, %s1550_s0 }
  0x18   :  { %p1332_p10 = pnand %p1330_p9, %p1327_p8 }
  0x1a   :  { %1335 = shalt.err (!%p1332_p10)
}
  0x1b   :  { %s1336_s1 = scalar_lea.vmem %s18_s27, 128  ;;  %p1341_p12 = scmp.lt.s32.totalorder %s18_s27, %s18_s27 }
  0x1c   :  { %p1337_p11 = scmp.ne.s32.totalorder %s18_s27, %s1336_s1  ;;  %p1342_p13 = scmp.lt.s32.totalorder %s1336_s1, %s1336_s1 }
  0x1e   :  { %p1343_p0 = por %p1342_p13, %p1341_p12 }
  0x20   :  { %p1344_p1 = pnand %p1343_p0, %p1337_p11 }
  0x22   :  { %1347 = shalt.err (!%p1344_p1)
}
  0x23   :  { %20 = dma.hbm_to_vmem [thread:$0]  %s1550_s0, 128, %s18_s27, [#allocation3]  }
  0x24   :  { %s1348_s14 = scalar_lea.hbm %s1552_s2, 128 }
  0x25   :  { %p1349_p2 = scmp.ne.s32.totalorder %s1552_s2, %s1348_s14  ;;  %p1352_p3 = scmp.lt.u32.totalorder %s1348_s14, %s1552_s2 }
  0x27   :  { %p1354_p4 = pnand %p1352_p3, %p1349_p2 }
  0x29   :  { %1357 = shalt.err (!%p1354_p4)
}
  0x2a   :  { %s1358_s19 = scalar_lea.vmem %s39_s29, 128  ;;  %p1363_p6 = scmp.lt.s32.totalorder %s39_s29, %s39_s29 }
  0x2b   :  { %p1359_p5 = scmp.ne.s32.totalorder %s39_s29, %s1358_s19  ;;  %p1364_p7 = scmp.lt.s32.totalorder %s1358_s19, %s1358_s19 }
  0x2d   :  { %p1365_p8 = por %p1364_p7, %p1363_p6 }
  0x2f   :  { %p1366_p9 = pnand %p1365_p8, %p1359_p5 }
  0x31   :  { %1369 = shalt.err (!%p1366_p9)
}
  0x32   :  { %s1403_s0 = smov 16   ;;  %s1404_s20 = smov 1  }
  0x33   :  { %44 = dma.hbm_to_vmem [thread:$0]  %s1552_s2, 128, %s39_s29, [#allocation6], %s1403_s0, %s1403_s0, %s1404_s20  }
  0x34   :  { %1392 = dma.done.wait [#allocation3], 128  }
  0x35   :  { %1393 = vsyncadd [#allocation3], 4294967168 }
  0x36   :  { %1394 = dma.done.wait [#allocation6], 8320  }
  0x37   :  { %1395 = vsyncadd [#allocation6], 4294958976  ;;  %v1405_v0 = vmov 0.0   ;;  %vm1406_vm0 = vmmov 0   ;;  %v1246_v1 = vld [vmem:[#allocation5] sm:$0xff]   ;;  %v1247_v2 = vld [vmem:[#allocation5 + $0x8] sm:$0xff]  }
  0x38   :  { %1088 = vmatprep.subr.bf16.mxu0 %v1405_v0  ;;  %1092 = vmatprep.mubr.msk.bf16.mxu0 %vm1406_vm0, %v1405_v0  ;;  %v55_v3 = vld [vmem:[#allocation2] sm:$0xff]  ;;  %v1248_v4 = vld [vmem:[#allocation5 + $0x40] sm:$0xff]   ;;  %v1249_v6 = vld [vmem:[#allocation5 + $0x48] sm:$0xff]   ;;  %vm80_vm1 = vcmask 261120   ;;  %s1407_s2 = smov [#allocation8]  }
  0x39   :  { %1096 = vmatprep.subr.bf16.mxu1 %v1405_v0  ;;  %1112 = vmatprep.mubr.msk.bf16.mxu1 %vm1406_vm0, %v1405_v0  ;;  %v60_v5 = vpack.c.bf16 %v55_v3, %v55_v3  ;;  %v1250_v7 = vld [vmem:[#allocation5 + $0x50] sm:$0xff]   ;;  %v1251_v8 = vld [vmem:[#allocation5 + $0x58] sm:$0xff]   ;;  %v1252_v9 = vld [vmem:[#allocation5 + $0x60] sm:$0xff]   ;;  %s945_s23 = sshll.u32 %s1407_s2, 4  ;;  %s946_s23 = int_to_ptr.vmem [resolvable:$true] %s945_s23 }
  0x3a   :  { %1089 = vmatpush3.bf16.msra.mxu0 %v1246_v1  ;;  %1097 = vmatpush3.bf16.msra.mxu1 %v1248_v4  ;;  %v1253_v10 = vld [vmem:[#allocation5 + $0x68] sm:$0xff]   ;;  %v1254_v11 = vld [vmem:[#allocation5 + $0x70] sm:$0xff]   ;;  %v1255_v12 = vld [vmem:[#allocation5 + $0x78] sm:$0xff]   ;;  %s1370_s24 = scalar_lea.vmem %s946_s23, 128  ;;  %p1375_p11 = scmp.lt.s32.totalorder %s946_s23, %s946_s23 }
  0x3b   :  { %1090 = vmatprep.subr.bf16.mxu0 %v1405_v0  ;;  %1098 = vmatprep.subr.bf16.mxu1 %v1405_v0  ;;  %v1256_v13 = vld [vmem:[#allocation5 + $0x80] sm:$0xff]   ;;  %v1257_v14 = vld [vmem:[#allocation5 + $0x88] sm:$0xff]   ;;  %v1258_v15 = vld [vmem:[#allocation5 + $0x90] sm:$0xff]   ;;  %p1371_p10 = scmp.ne.s32.totalorder %s946_s23, %s1370_s24  ;;  %p1376_p12 = scmp.lt.s32.totalorder %s1370_s24, %s1370_s24 }
  0x3c   :  { %v1259_v16 = vld [vmem:[#allocation5 + $0x98] sm:$0xff]   ;;  %v1260_v17 = vld [vmem:[#allocation5 + $0xa0] sm:$0xff]   ;;  %v1261_v18 = vld [vmem:[#allocation5 + $0xa8] sm:$0xff]  }
  0x3d   :  { %v955_v19 = vld [vmem:[#allocation7] ss:$0 sm:$0xff]  ;;  %v1262_v28 = vld [vmem:[#allocation5 + $0xb0] sm:$0xff]   ;;  %v1263_v29 = vld [vmem:[#allocation5 + $0xb8] sm:$0xff]   ;;  %p1377_p13 = por %p1376_p12, %p1375_p11 }
  0x3e   :  { %1091 = vmatpush3.bf16.msra.mxu0 %v1247_v2  ;;  %1099 = vmatpush3.bf16.msra.mxu1 %v1249_v6  ;;  %v1264_v30 = vld [vmem:[#allocation5 + $0xc0] sm:$0xff]   ;;  %v1265_v31 = vld [vmem:[#allocation5 + $0xc8] sm:$0xff]   ;;  %v1266_v32 = vld [vmem:[#allocation5 + $0xd0] sm:$0xff]  }
  0x3f   :  { %1116 = vmatprep.subr.bf16.mxu0 %v1405_v0  ;;  %1100 = vmatprep.subr.bf16.mxu1 %v1405_v0  ;;  %v1267_v33 = vld [vmem:[#allocation5 + $0xd8] sm:$0xff]   ;;  %v1268_v34 = vld [vmem:[#allocation5 + $0xe0] sm:$0xff]   ;;  %v1269_v35 = vld [vmem:[#allocation5 + $0xe8] sm:$0xff]   ;;  %p1378_p0 = pnand %p1377_p13, %p1371_p10 }
  0x40   :  { %v959_v36 = vld [vmem:[#allocation7 + $0x1] ss:$0 sm:$0xff]  ;;  %v1270_v45 = vld [vmem:[#allocation5 + $0xf0] sm:$0xff]   ;;  %v1271_v46 = vld [vmem:[#allocation5 + $0xf8] sm:$0xff]  }
  0x41   :  { %1093 = vmatmul.mubr.msk.bf16.vlgmr.msra.gmra.mrb[0].mxu0 %vm80_vm1, %v60_v5  ;;  %v1272_v47 = vld [vmem:[#allocation5 + $0x100] sm:$0xff]   ;;  %v1273_v48 = vld [vmem:[#allocation5 + $0x108] sm:$0xff]   ;;  %v1274_v49 = vld [vmem:[#allocation5 + $0x110] sm:$0xff]  }
  0x42   :  { %1132 = vmatprep.mubr.msk.bf16.mxu0 %vm1406_vm0, %v1405_v0  ;;  %1101 = vmatpush3.bf16.msra.mxu1 %v1250_v7  ;;  %v1275_v50 = vld [vmem:[#allocation5 + $0x118] sm:$0xff]   ;;  %v1276_v51 = vld [vmem:[#allocation5 + $0x120] sm:$0xff]   ;;  %v1277_v52 = vld [vmem:[#allocation5 + $0x128] sm:$0xff]  }
  0x43   :  { %1102 = vmatprep.subr.bf16.mxu1 %v1405_v0  ;;  %1117 = vmatpush3.bf16.msra.mxu0 %v1256_v13  ;;  %v968_v53 = vld [vmem:[#allocation7 + $0x2] ss:$0 sm:$0xff]  ;;  %v1278_v62 = vld [vmem:[#allocation5 + $0x130] sm:$0xff]   ;;  %v1279_v63 = vld [vmem:[#allocation5 + $0x138] sm:$0xff]  }
  0x44   :  { %1118 = vmatprep.subr.bf16.mxu0 %v1405_v0  ;;  %v1280_v1 = vld [vmem:[#allocation5 + $0x140] sm:$0xff]   ;;  %v1281_v2 = vld [vmem:[#allocation5 + $0x148] sm:$0xff]   ;;  %v1282_v3 = vld [vmem:[#allocation5 + $0x150] sm:$0xff]  }
  0x45   :  { %v1283_v4 = vld [vmem:[#allocation5 + $0x158] sm:$0xff]   ;;  %v1284_v5 = vld [vmem:[#allocation5 + $0x160] sm:$0xff]   ;;  %v1285_v6 = vld [vmem:[#allocation5 + $0x168] sm:$0xff]  }
  0x46   :  { %1103 = vmatpush3.bf16.msra.mxu1 %v1251_v8  ;;  %v977_v7 = vld [vmem:[#allocation7 + $0x3] ss:$0 sm:$0xff] }
  0x47   :  { %1104 = vmatprep.subr.bf16.mxu1 %v1405_v0  ;;  %1119 = vmatpush3.bf16.msra.mxu0 %v1257_v14 }
  0x48   :  { %1120 = vmatprep.subr.bf16.mxu0 %v1405_v0 }
  0x4a   :  { %1105 = vmatpush3.bf16.msra.mxu1 %v1252_v9 }
  0x4b   :  { %1106 = vmatprep.subr.bf16.mxu1 %v1405_v0  ;;  %1121 = vmatpush3.bf16.msra.mxu0 %v1258_v15 }
  0x4c   :  { %1122 = vmatprep.subr.bf16.mxu0 %v1405_v0 }
  0x4e   :  { %1107 = vmatpush3.bf16.msra.mxu1 %v1253_v10 }
  0x4f   :  { %1108 = vmatprep.subr.bf16.mxu1 %v1405_v0  ;;  %1123 = vmatpush3.bf16.msra.mxu0 %v1259_v16  ;;  %v1286_v16 = vld [vmem:[#allocation5 + $0x170] sm:$0xff]  }
  0x50   :  { %1124 = vmatprep.subr.bf16.mxu0 %v1405_v0 }
  0x52   :  { %1109 = vmatpush3.bf16.msra.mxu1 %v1254_v11 }
  0x53   :  { %1110 = vmatprep.subr.bf16.mxu1 %v1405_v0  ;;  %1125 = vmatpush3.bf16.msra.mxu0 %v1260_v17  ;;  %v1287_v17 = vld [vmem:[#allocation5 + $0x178] sm:$0xff]  }
  0x54   :  { %1126 = vmatprep.subr.bf16.mxu0 %v1405_v0 }
  0x56   :  { %1111 = vmatpush3.bf16.msra.mxu1 %v1255_v12 }
  0x57   :  { %1136 = vmatprep.subr.bf16.mxu1 %v1405_v0  ;;  %1127 = vmatpush3.bf16.msra.mxu0 %v1261_v18  ;;  %v1288_v18 = vld [vmem:[#allocation5 + $0x180] sm:$0xff]  }
  0x58   :  { %1128 = vmatprep.subr.bf16.mxu0 %v1405_v0 }
  0x5b   :  { %1129 = vmatpush3.bf16.msra.mxu0 %v1262_v28 }
  0x5c   :  { %1130 = vmatprep.subr.bf16.mxu0 %v1405_v0 }
  0x5f   :  { %1131 = vmatpush3.bf16.msra.mxu0 %v1263_v29 }
  0x60   :  { %1156 = vmatprep.subr.bf16.mxu0 %v1405_v0 }
 0x114   :  { %v118_v20 = vpop.f32.mrb[0].mxu0 }
 0x115   :  { %v119_v21 = vadd.f32 %v955_v19, %v118_v20  ;;  %v1094_v22 = vpop.f32.mrb[1].mxu0  ;;  %v1289_v19 = vld [vmem:[#allocation5 + $0x188] sm:$0xff]   ;;  %v1290_v20 = vld [vmem:[#allocation5 + $0x190] sm:$0xff]  }
 0x116   :  { %v121_v23 = vpop.f32.mrb[2].mxu0  ;;  %v1292_v22 = vld [vmem:[#allocation5 + $0x1a0] sm:$0xff]  }
 0x117   :  { %v124_v24 = vmul.f32 0.2, %v119_v21  ;;  %v1095_v25 = vpop.f32.mrb[3].mxu0  ;;  %v1293_v23 = vld [vmem:[#allocation5 + $0x1a8] sm:$0xff]  }
 0x119   :  { %v125_v26 = vmax.f32 %v119_v21, %v124_v24  ;;  %v1291_v21 = vld [vmem:[#allocation5 + $0x198] sm:$0xff]   ;;  %v986_v24 = vld [vmem:[#allocation7 + $0x4] ss:$0 sm:$0xff] }
 0x11b   :  { %v126_v27 = vpack.c.bf16 %v125_v26, %v125_v26 }
 0x11d   :  { %1113 = vmatmul.mubr.bf16.vlgmr.msra.gmra.mrb[0].mxu1 %v126_v27 }
 0x11e   :  { %1152 = vmatprep.mubr.msk.bf16.mxu1 %vm1406_vm0, %v1405_v0  ;;  %1137 = vmatpush3.bf16.msra.mxu1 %v1264_v30 }
 0x11f   :  { %1138 = vmatprep.subr.bf16.mxu1 %v1405_v0 }
 0x122   :  { %1139 = vmatpush3.bf16.msra.mxu1 %v1265_v31 }
 0x123   :  { %1140 = vmatprep.subr.bf16.mxu1 %v1405_v0 }
 0x126   :  { %1141 = vmatpush3.bf16.msra.mxu1 %v1266_v32 }
 0x127   :  { %1142 = vmatprep.subr.bf16.mxu1 %v1405_v0 }
 0x12a   :  { %1143 = vmatpush3.bf16.msra.mxu1 %v1267_v33  ;;  %v1294_v33 = vld [vmem:[#allocation5 + $0x1b0] sm:$0xff]  }
 0x12b   :  { %1144 = vmatprep.subr.bf16.mxu1 %v1405_v0 }
 0x12e   :  { %1145 = vmatpush3.bf16.msra.mxu1 %v1268_v34  ;;  %v1295_v34 = vld [vmem:[#allocation5 + $0x1b8] sm:$0xff]  }
 0x12f   :  { %1146 = vmatprep.subr.bf16.mxu1 %v1405_v0 }
 0x132   :  { %1147 = vmatpush3.bf16.msra.mxu1 %v1269_v35  ;;  %v1296_v35 = vld [vmem:[#allocation5 + $0x1c0] sm:$0xff]  }
 0x133   :  { %1148 = vmatprep.subr.bf16.mxu1 %v1405_v0 }
 0x136   :  { %1149 = vmatpush3.bf16.msra.mxu1 %v1270_v45 }
 0x137   :  { %1150 = vmatprep.subr.bf16.mxu1 %v1405_v0 }
 0x13a   :  { %1151 = vmatpush3.bf16.msra.mxu1 %v1271_v46 }
 0x13b   :  { %1176 = vmatprep.subr.bf16.mxu1 %v1405_v0 }
 0x1f0   :  { %v234_v37 = vpop.f32.mrb[0].mxu1 }
 0x1f1   :  { %v235_v38 = vadd.f32 %v959_v36, %v234_v37  ;;  %v1114_v39 = vpop.f32.mrb[1].mxu1  ;;  %v1297_v36 = vld [vmem:[#allocation5 + $0x1c8] sm:$0xff]   ;;  %v1298_v37 = vld [vmem:[#allocation5 + $0x1d0] sm:$0xff]  }
 0x1f2   :  { %v237_v40 = vpop.f32.mrb[2].mxu1  ;;  %v1300_v39 = vld [vmem:[#allocation5 + $0x1e0] sm:$0xff]  }
 0x1f3   :  { %v240_v41 = vmul.f32 0.2, %v235_v38  ;;  %v1115_v42 = vpop.f32.mrb[3].mxu1  ;;  %v1301_v40 = vld [vmem:[#allocation5 + $0x1e8] sm:$0xff]  }
 0x1f5   :  { %v241_v43 = vmax.f32 %v235_v38, %v240_v41  ;;  %v1299_v38 = vld [vmem:[#allocation5 + $0x1d8] sm:$0xff]   ;;  %v995_v41 = vld [vmem:[#allocation7 + $0x5] ss:$0 sm:$0xff] }
 0x1f7   :  { %v242_v44 = vpack.c.bf16 %v241_v43, %v241_v43 }
 0x1f9   :  { %1133 = vmatmul.mubr.bf16.vlgmr.msra.gmra.mrb[4].mxu0 %v242_v44 }
 0x1fa   :  { %1172 = vmatprep.mubr.msk.bf16.mxu0 %vm1406_vm0, %v1405_v0  ;;  %1157 = vmatpush3.bf16.msra.mxu0 %v1272_v47 }
 0x1fb   :  { %1158 = vmatprep.subr.bf16.mxu0 %v1405_v0 }
 0x1fe   :  { %1159 = vmatpush3.bf16.msra.mxu0 %v1273_v48 }
 0x1ff   :  { %1160 = vmatprep.subr.bf16.mxu0 %v1405_v0 }
 0x202   :  { %1161 = vmatpush3.bf16.msra.mxu0 %v1274_v49 }
 0x203   :  { %1162 = vmatprep.subr.bf16.mxu0 %v1405_v0 }
 0x206   :  { %1163 = vmatpush3.bf16.msra.mxu0 %v1275_v50  ;;  %v1302_v50 = vld [vmem:[#allocation5 + $0x1f0] sm:$0xff]  }
 0x207   :  { %1164 = vmatprep.subr.bf16.mxu0 %v1405_v0 }
 0x20a   :  { %1165 = vmatpush3.bf16.msra.mxu0 %v1276_v51  ;;  %v1303_v51 = vld [vmem:[#allocation5 + $0x1f8] sm:$0xff]  }
 0x20b   :  { %1166 = vmatprep.subr.bf16.mxu0 %v1405_v0 }
 0x20e   :  { %1167 = vmatpush3.bf16.msra.mxu0 %v1277_v52  ;;  %v1004_v52 = vld [vmem:[#allocation7 + $0x6] ss:$0 sm:$0xff] }
 0x20f   :  { %1168 = vmatprep.subr.bf16.mxu0 %v1405_v0 }
 0x212   :  { %1169 = vmatpush3.bf16.msra.mxu0 %v1278_v62 }
 0x213   :  { %1170 = vmatprep.subr.bf16.mxu0 %v1405_v0 }
 0x216   :  { %1171 = vmatpush3.bf16.msra.mxu0 %v1279_v63 }
 0x217   :  { %1196 = vmatprep.subr.bf16.mxu0 %v1405_v0 }
 0x2cc   :  { %v350_v54 = vpop.f32.mrb[4].mxu0 }
 0x2cd   :  { %v351_v55 = vadd.f32 %v968_v53, %v350_v54  ;;  %v1134_v56 = vpop.f32.mrb[5].mxu0 }
 0x2ce   :  { %v353_v57 = vpop.f32.mrb[6].mxu0 }
 0x2cf   :  { %v356_v58 = vmul.f32 0.2, %v351_v55  ;;  %v1135_v59 = vpop.f32.mrb[7].mxu0 }
 0x2d1   :  { %v357_v60 = vmax.f32 %v351_v55, %v356_v58 }
 0x2d3   :  { %v358_v61 = vpack.c.bf16 %v357_v60, %v357_v60 }
 0x2d5   :  { %1153 = vmatmul.mubr.bf16.vlgmr.msra.gmra.mrb[4].mxu1 %v358_v61  ;;  %v1013_v61 = vld [vmem:[#allocation7 + $0x7] ss:$0 sm:$0xff] }
 0x2d6   :  { %1192 = vmatprep.mubr.msk.bf16.mxu1 %vm1406_vm0, %v1405_v0  ;;  %1177 = vmatpush3.bf16.msra.mxu1 %v1280_v1 }
 0x2d7   :  { %1178 = vmatprep.subr.bf16.mxu1 %v1405_v0 }
 0x2da   :  { %1179 = vmatpush3.bf16.msra.mxu1 %v1281_v2 }
 0x2db   :  { %1180 = vmatprep.subr.bf16.mxu1 %v1405_v0 }
 0x2de   :  { %1181 = vmatpush3.bf16.msra.mxu1 %v1282_v3 }
 0x2df   :  { %1182 = vmatprep.subr.bf16.mxu1 %v1405_v0 }
 0x2e2   :  { %1183 = vmatpush3.bf16.msra.mxu1 %v1283_v4 }
 0x2e3   :  { %1184 = vmatprep.subr.bf16.mxu1 %v1405_v0 }
 0x2e6   :  { %1185 = vmatpush3.bf16.msra.mxu1 %v1284_v5 }
 0x2e7   :  { %1186 = vmatprep.subr.bf16.mxu1 %v1405_v0 }
 0x2ea   :  { %1187 = vmatpush3.bf16.msra.mxu1 %v1285_v6 }
 0x2eb   :  { %1188 = vmatprep.subr.bf16.mxu1 %v1405_v0 }
 0x2ee   :  { %1189 = vmatpush3.bf16.msra.mxu1 %v1286_v16 }
 0x2ef   :  { %1190 = vmatprep.subr.bf16.mxu1 %v1405_v0 }
 0x2f2   :  { %1191 = vmatpush3.bf16.msra.mxu1 %v1287_v17 }
 0x2f3   :  { %1216 = vmatprep.subr.bf16.mxu1 %v1405_v0 }
 0x3a8   :  { %v466_v8 = vpop.f32.mrb[4].mxu1 }
 0x3a9   :  { %v467_v9 = vadd.f32 %v977_v7, %v466_v8  ;;  %v1154_v10 = vpop.f32.mrb[5].mxu1 }
 0x3aa   :  { %v469_v11 = vpop.f32.mrb[6].mxu1 }
 0x3ab   :  { %v472_v12 = vmul.f32 0.2, %v467_v9  ;;  %v1155_v13 = vpop.f32.mrb[7].mxu1 }
 0x3ad   :  { %v473_v14 = vmax.f32 %v467_v9, %v472_v12 }
 0x3af   :  { %v474_v15 = vpack.c.bf16 %v473_v14, %v473_v14 }
 0x3b1   :  { %1173 = vmatmul.mubr.bf16.vlgmr.msra.gmra.mrb[8].mxu0 %v474_v15 }
 0x3b2   :  { %1212 = vmatprep.mubr.msk.bf16.mxu0 %vm1406_vm0, %v1405_v0  ;;  %1197 = vmatpush3.bf16.msra.mxu0 %v1288_v18 }
 0x3b3   :  { %1198 = vmatprep.subr.bf16.mxu0 %v1405_v0 }
 0x3b6   :  { %1199 = vmatpush3.bf16.msra.mxu0 %v1289_v19 }
 0x3b7   :  { %1200 = vmatprep.subr.bf16.mxu0 %v1405_v0 }
 0x3ba   :  { %1201 = vmatpush3.bf16.msra.mxu0 %v1290_v20 }
 0x3bb   :  { %1202 = vmatprep.subr.bf16.mxu0 %v1405_v0 }
 0x3be   :  { %1203 = vmatpush3.bf16.msra.mxu0 %v1291_v21 }
 0x3bf   :  { %1204 = vmatprep.subr.bf16.mxu0 %v1405_v0 }
 0x3c2   :  { %1205 = vmatpush3.bf16.msra.mxu0 %v1292_v22 }
 0x3c3   :  { %1206 = vmatprep.subr.bf16.mxu0 %v1405_v0 }
 0x3c6   :  { %1207 = vmatpush3.bf16.msra.mxu0 %v1293_v23 }
 0x3c7   :  { %1208 = vmatprep.subr.bf16.mxu0 %v1405_v0 }
 0x3ca   :  { %1209 = vmatpush3.bf16.msra.mxu0 %v1294_v33 }
 0x3cb   :  { %1210 = vmatprep.subr.bf16.mxu0 %v1405_v0 }
 0x3ce   :  { %1211 = vmatpush3.bf16.msra.mxu0 %v1295_v34 }
 0x484   :  { %v582_v25 = vpop.f32.mrb[8].mxu0 }
 0x485   :  { %v583_v26 = vadd.f32 %v986_v24, %v582_v25  ;;  %v1174_v27 = vpop.f32.mrb[9].mxu0 }
 0x486   :  { %v585_v28 = vpop.f32.mrb[10].mxu0 }
 0x487   :  { %v588_v29 = vmul.f32 0.2, %v583_v26  ;;  %v1175_v30 = vpop.f32.mrb[11].mxu0 }
 0x489   :  { %v589_v31 = vmax.f32 %v583_v26, %v588_v29 }
 0x48b   :  { %v590_v32 = vpack.c.bf16 %v589_v31, %v589_v31 }
 0x48d   :  { %1193 = vmatmul.mubr.bf16.vlgmr.msra.gmra.mrb[8].mxu1 %v590_v32 }
 0x48e   :  { %1232 = vmatprep.mubr.msk.bf16.mxu1 %vm1406_vm0, %v1405_v0  ;;  %1217 = vmatpush3.bf16.msra.mxu1 %v1296_v35 }
 0x48f   :  { %1218 = vmatprep.subr.bf16.mxu1 %v1405_v0 }
 0x492   :  { %1219 = vmatpush3.bf16.msra.mxu1 %v1297_v36 }
 0x493   :  { %1220 = vmatprep.subr.bf16.mxu1 %v1405_v0 }
 0x496   :  { %1221 = vmatpush3.bf16.msra.mxu1 %v1298_v37 }
 0x497   :  { %1222 = vmatprep.subr.bf16.mxu1 %v1405_v0 }
 0x49a   :  { %1223 = vmatpush3.bf16.msra.mxu1 %v1299_v38 }
 0x49b   :  { %1224 = vmatprep.subr.bf16.mxu1 %v1405_v0 }
 0x49e   :  { %1225 = vmatpush3.bf16.msra.mxu1 %v1300_v39 }
 0x49f   :  { %1226 = vmatprep.subr.bf16.mxu1 %v1405_v0 }
 0x4a2   :  { %1227 = vmatpush3.bf16.msra.mxu1 %v1301_v40 }
 0x4a3   :  { %1228 = vmatprep.subr.bf16.mxu1 %v1405_v0 }
 0x4a6   :  { %1229 = vmatpush3.bf16.msra.mxu1 %v1302_v50 }
 0x4a7   :  { %1230 = vmatprep.subr.bf16.mxu1 %v1405_v0 }
 0x4aa   :  { %1231 = vmatpush3.bf16.msra.mxu1 %v1303_v51 }
 0x560   :  { %v698_v42 = vpop.f32.mrb[8].mxu1 }
 0x561   :  { %v699_v43 = vadd.f32 %v995_v41, %v698_v42  ;;  %v1194_v44 = vpop.f32.mrb[9].mxu1 }
 0x562   :  { %v701_v45 = vpop.f32.mrb[10].mxu1 }
 0x563   :  { %v704_v46 = vmul.f32 0.2, %v699_v43  ;;  %v1195_v47 = vpop.f32.mrb[11].mxu1 }
 0x565   :  { %v705_v48 = vmax.f32 %v699_v43, %v704_v46 }
 0x567   :  { %v706_v49 = vpack.c.bf16 %v705_v48, %v705_v48 }
 0x569   :  { %1213 = vmatmul.mubr.bf16.vlgmr.msra.gmra.mrb[12].mxu0 %v706_v49 }
 0x63c   :  { %v814_v53 = vpop.f32.mrb[12].mxu0 }
 0x63d   :  { %v815_v54 = vadd.f32 %v1004_v52, %v814_v53  ;;  %v1214_v55 = vpop.f32.mrb[13].mxu0 }
 0x63e   :  { %v817_v56 = vpop.f32.mrb[14].mxu0 }
 0x63f   :  { %v820_v57 = vmul.f32 0.2, %v815_v54  ;;  %v1215_v58 = vpop.f32.mrb[15].mxu0 }
 0x641   :  { %v821_v59 = vmax.f32 %v815_v54, %v820_v57 }
 0x643   :  { %v822_v60 = vpack.c.bf16 %v821_v59, %v821_v59 }
 0x645   :  { %1233 = vmatmul.mubr.bf16.vlgmr.msra.gmra.mrb[12].mxu1 %v822_v60 }
 0x718   :  { %v930_v62 = vpop.f32.mrb[12].mxu1 }
 0x719   :  { %v931_v63 = vadd.f32 %v1013_v61, %v930_v62  ;;  %v1234_v1 = vpop.f32.mrb[13].mxu1 }
 0x71a   :  { %v933_v2 = vpop.f32.mrb[14].mxu1 }
 0x71b   :  { %v936_v0 = vmul.f32 0.2, %v931_v63  ;;  %v1235_v3 = vpop.f32.mrb[15].mxu1 }
 0x71d   :  { %v937_v4 = vmax.f32 %v931_v63, %v936_v0 }
 0x71f   :  { %938 = vst [vmem:[#allocation8] sm:$0xff] %v937_v4 }
 0x720   :  { %1381 = shalt.err (!%p1378_p0)
}
 0x721   :  { %s1382_s27 = scalar_lea.hbm %s1553_s3, 128 }
 0x722   :  { %p1383_p1 = scmp.ne.s32.totalorder %s1553_s3, %s1382_s27  ;;  %p1386_p2 = scmp.lt.u32.totalorder %s1382_s27, %s1553_s3 }
 0x724   :  { %p1388_p3 = pnand %p1386_p2, %p1383_p1 }
 0x726   :  { %1391 = shalt.err (!%p1388_p3)
}
 0x727   :  { %948 = dma.vmem_to_hbm [thread:$0]  %s946_s23, 128, %s1553_s3, [#allocation4]  }
 0x728   :  { %1396 = dma.done.wait [#allocation4], 128  }
 0x729   :  { %1397 = vsyncadd [#allocation4], 4294967168 }
 0x72a   :  { %952 = vsyncpa [#allocation3], 1 }
 0x72b   :  { %953 = vsyncpa [#allocation6], 1 }
 0x72c   :  { %954 = vsyncpa [#allocation4], 1 }

</bundles_post_ra>
